<compile_context>
chip_gen: v6e
topology: v6e:2x2x1
jax: 0.10.0
libtpu: 0.0.40
codegen_flags: <defaults>
</compile_context>

<pallas_src>
import jax
import jax.numpy as jnp
from jax.experimental import pallas as pl
from jax.experimental.pallas import tpu as pltpu


def _patch_embed_kernel(patches_ref, w_ref, bias_ref, pos_ref, out_ref):
    # patches_ref: (1, TN, K) bf16 ; w_ref: (K, Ep) bf16
    # bias_ref:    (1, Ep)   bf16 ; pos_ref: (TN, Ep) bf16
    x = patches_ref[0]                                                  # (TN, K)
    # bf16-in / f32-acc MXU matmul (native fast path on v5e/v6e/v7x).
    acc = jnp.dot(x, w_ref[...], preferred_element_type=jnp.float32)   # (TN, Ep)
    # Conv bias + positional embedding added in f32 in the epilogue (VALU slack).
    acc = acc + bias_ref[...].astype(jnp.float32)                      # broadcast row
    acc = acc + pos_ref[...].astype(jnp.float32)
    out_ref[0] = acc.astype(out_ref.dtype)


def _device_tuning():
    """(max sequence tile, scoped VMEM limit bytes) per TPU generation."""
    kind = ""
    try:
        kind = jax.devices()[0].device_kind.lower()
    except Exception:
        pass
    if ("v5" in kind) or ("v6" in kind):
        # 128 MiB physical VMEM: large tiles amortize the ~0.35 us/step overhead.
        return 2048, 80 * 1024 * 1024
    # v7x (64 MiB physical VMEM per TC) or unknown generation: stay conservative
    # so double buffers + the f32 dot intermediate leave compiler-scratch headroom.
    return 1024, 48 * 1024 * 1024


def _choose_seq_tile(num_patches, max_tile):
    """Largest tile (multiple of 8, <= max_tile) dividing num_patches."""
    for t in (2048, 1024, 512, 256, 128, 64, 32, 16, 8):
        if t <= max_tile and num_patches % t == 0:
            return t
    return num_patches  # falls back to the full dim (always legal)


def patch_embed_forward(latent, proj_weight, proj_bias, pos_embed,
                        patch_size, pos_embed_max_size):
    """latent: (B, C, H, W); proj_weight: (E, C, p, p); proj_bias: (E,);
    pos_embed: (1, M, M, E). Returns (B, (H//p)*(W//p), E)."""
    B, C, H, W = latent.shape
    E = proj_weight.shape[0]
    p = patch_size
    Hp, Wp = H // p, W // p
    Np = Hp * Wp
    K = C * p * p

    # --- glue: patchify (matches the conv weight flatten order (c, i, j)) ---
    # TODO(synk): at production scale, DMA (1, C, p*rows, W) slabs of `latent`
    # directly via BlockSpec and flatten in-kernel to skip this HBM round trip.
    patches = latent.reshape(B, C, Hp, p, Wp, p)
    patches = patches.transpose(0, 2, 4, 1, 3, 5)             # (B, Hp, Wp, C, p, p)
    patches = patches.reshape(B, Np, K)

    w2d = proj_weight.reshape(E, K).T                         # (K, E)
    bias2d = proj_bias.reshape(1, E)                          # (1, E)

    # --- glue: cropped positional embedding (bias is NOT folded in) ---
    # TODO(synk): stream pos_embed directly from HBM with pl.Element offsets for
    # (top, left) to remove this crop copy as well (needs TN % Wp == 0).
    top = (pos_embed_max_size - Hp) // 2
    left = (pos_embed_max_size - Wp) // 2
    pos = pos_embed[0, top:top + Hp, left:left + Wp, :].reshape(Np, E)

    # --- lane-dense output: pad E up to a multiple of 128 if needed ---
    E_pad = ((E + 127) // 128) * 128
    if E_pad != E:
        w2d = jnp.pad(w2d, ((0, 0), (0, E_pad - E)))
        bias2d = jnp.pad(bias2d, ((0, 0), (0, E_pad - E)))
        pos = jnp.pad(pos, ((0, 0), (0, E_pad - E)))

    max_tile, vmem_limit = _device_tuning()
    TN = _choose_seq_tile(Np, max_tile)
    # Grid: sequence tiles outer ("parallel" -> cores split on Np), batch
    # innermost ("arbitrary") so pos/weight/bias tiles stay resident across B.
    grid = (Np // TN, B)

    cost = pl.CostEstimate(
        flops=2 * B * Np * K * E_pad,
        transcendentals=0,
        bytes_accessed=2 * (B * Np * K            # patches read
                            + B * Np * E_pad      # output write
                            + Np * E_pad          # pos read (resident across B)
                            + K * E_pad + E_pad), # weight + bias
    )

    out = pl.pallas_call(
        _patch_embed_kernel,
        out_shape=jax.ShapeDtypeStruct((B, Np, E_pad), latent.dtype),
        grid_spec=pltpu.PrefetchScalarGridSpec(
            num_scalar_prefetch=0,
            grid=grid,
            in_specs=[
                pl.BlockSpec((1, TN, K), lambda n, b: (b, n, 0)),      # patches
                pl.BlockSpec((K, E_pad), lambda n, b: (0, 0)),         # weight (resident)
                pl.BlockSpec((1, E_pad), lambda n, b: (0, 0)),         # bias (resident)
                pl.BlockSpec((TN, E_pad), lambda n, b: (n, 0)),        # pos, Np-tiled
            ],
            out_specs=pl.BlockSpec((1, TN, E_pad), lambda n, b: (b, n, 0)),
        ),
        compiler_params=pltpu.CompilerParams(
            dimension_semantics=("parallel", "arbitrary"),
            vmem_limit_bytes=vmem_limit,
        ),
        cost_estimate=cost,
    )(patches, w2d, bias2d, pos)

    if E_pad != E:
        out = out[..., :E]
    return out


if __name__ == "__main__":
    # Small shapes consistent with the module's forward:
    #   patch_size=2, in_channels=4, embed_dim=32, pos_embed_max_size=16
    #   latent: (B=2, C=4, H=16, W=16) -> output (2, 64, 32)
    patch_size = 2
    in_channels = 4
    embed_dim = 32
    pos_embed_max_size = 16
    B, H, W = 2, 16, 16
    dtype = jnp.bfloat16

    key = jax.random.PRNGKey(0)
    k_x, k_w, k_b, k_pos = jax.random.split(key, 4)

    latent = jax.random.normal(k_x, (B, in_channels, H, W), dtype=dtype)
    # Conv2d(in_channels, embed_dim, kernel=(p,p), stride=p) parameters.
    proj_weight = (jax.random.normal(
        k_w, (embed_dim, in_channels, patch_size, patch_size)) * 0.05).astype(dtype)
    proj_bias = (jax.random.normal(k_b, (embed_dim,)) * 0.05).astype(dtype)
    # Module initializes pos_embed to zeros; use small random values here so the
    # add path is actually exercised (deterministic, in-script).
    pos_embed = (jax.random.normal(
        k_pos, (1, pos_embed_max_size, pos_embed_max_size, embed_dim)) * 0.02).astype(dtype)

    out = patch_embed_forward(latent, proj_weight, proj_bias, pos_embed,
                              patch_size, pos_embed_max_size)
    out = jax.block_until_ready(out)

    # Reference check in plain JAX (float32).
    p = patch_size
    Hp, Wp = H // p, W // p
    patches = latent.astype(jnp.float32).reshape(B, in_channels, Hp, p, Wp, p)
    patches = patches.transpose(0, 2, 4, 1, 3, 5).reshape(B, Hp * Wp, -1)
    w2d = proj_weight.astype(jnp.float32).reshape(embed_dim, -1).T
    ref = patches @ w2d + proj_bias.astype(jnp.float32)
    top = (pos_embed_max_size - Hp) // 2
    left = (pos_embed_max_size - Wp) // 2
    ref = ref + pos_embed.astype(jnp.float32)[0, top:top + Hp,
                                              left:left + Wp, :].reshape(Hp * Wp, -1)
    assert out.shape == (B, Hp * Wp, embed_dim), out.shape
    assert jnp.allclose(out.astype(jnp.float32), ref, atol=3e-2, rtol=3e-2)
    print("KERNEL_OK")
</pallas_src>

<mosaic_0001>
module attributes {stable_mosaic.version = 11 : i64} {
  func.func @_patch_embed_kernel(%arg0: i32, %arg1: i32, %arg2: memref<1x64x16xbf16, #tpu.memory_space<vmem>>, %arg3: memref<16x128xbf16, #tpu.memory_space<vmem>>, %arg4: memref<1x128xbf16, #tpu.memory_space<vmem>>, %arg5: memref<64x128xbf16, #tpu.memory_space<vmem>>, %arg6: memref<1x64x128xbf16, #tpu.memory_space<vmem>>) attributes {dimension_semantics = [#tpu.dimension_semantics<parallel>, #tpu.dimension_semantics<arbitrary>], iteration_bounds = array<i64: 1, 2>, scalar_prefetch = 0 : i64, scratch_operands = 0 : i64, tpu.core_type = #tpu.core_type<tc>, window_params = [{transform_indices = @transform_0, window_bounds = array<i64: 1, 64, 16>}, {pipeline_mode = #tpu.pipeline_mode<synchronous>, transform_indices = @transform_1, window_bounds = array<i64: 16, 128>}, {pipeline_mode = #tpu.pipeline_mode<synchronous>, transform_indices = @transform_2, window_bounds = array<i64: 1, 128>}, {transform_indices = @transform_3, window_bounds = array<i64: 64, 128>}, {transform_indices = @transform_4, window_bounds = array<i64: 1, 64, 128>}]} {
    %c0 = arith.constant 0 : index
    %c0_0 = arith.constant 0 : index
    %c0_1 = arith.constant 0 : index
    %0 = vector.load %arg2[%c0, %c0_0, %c0_1] : memref<1x64x16xbf16, #tpu.memory_space<vmem>>, vector<1x64x16xbf16>
    %1 = vector.shape_cast %0 : vector<1x64x16xbf16> to vector<64x16xbf16>
    %c0_2 = arith.constant 0 : index
    %c0_3 = arith.constant 0 : index
    %2 = vector.load %arg3[%c0_2, %c0_3] : memref<16x128xbf16, #tpu.memory_space<vmem>>, vector<16x128xbf16>
    %cst = arith.constant dense<0.000000e+00> : vector<64x128xf32>
    %3 = tpu.matmul %1, %2, %cst {dimension_numbers = #tpu.dot_dimension_numbers<[1], [0], [0], [1], [0, 0, 1, 1], [], []>} : vector<64x16xbf16>, vector<16x128xbf16>, vector<64x128xf32> -> vector<64x128xf32>
    %c0_4 = arith.constant 0 : index
    %c0_5 = arith.constant 0 : index
    %4 = vector.load %arg4[%c0_4, %c0_5] : memref<1x128xbf16, #tpu.memory_space<vmem>>, vector<1x128xbf16>
    %5 = arith.extf %4 : vector<1x128xbf16> to vector<1x128xf32>
    %6 = vector.broadcast %5 : vector<1x128xf32> to vector<64x128xf32>
    %7 = arith.addf %3, %6 : vector<64x128xf32>
    %c0_6 = arith.constant 0 : index
    %c0_7 = arith.constant 0 : index
    %8 = vector.load %arg5[%c0_6, %c0_7] : memref<64x128xbf16, #tpu.memory_space<vmem>>, vector<64x128xbf16>
    %9 = arith.extf %8 : vector<64x128xbf16> to vector<64x128xf32>
    %10 = arith.addf %7, %9 : vector<64x128xf32>
    %11 = arith.truncf %10 : vector<64x128xf32> to vector<64x128xbf16>
    %c0_8 = arith.constant 0 : index
    %c0_9 = arith.constant 0 : index
    %c0_10 = arith.constant 0 : index
    %12 = vector.load %arg6[%c0_8, %c0_9, %c0_10] : memref<1x64x128xbf16, #tpu.memory_space<vmem>>, vector<1x64x128xbf16>
    %13 = vector.shape_cast %12 : vector<1x64x128xbf16> to vector<64x128xbf16>
    %14 = vector.shape_cast %11 : vector<64x128xbf16> to vector<1x64x128xbf16>
    tpu.vector_store %arg6[%c0_8, %c0_9, %c0_10], %14 {strides = array<i32>} : memref<1x64x128xbf16, #tpu.memory_space<vmem>>, vector<1x64x128xbf16>,
    return
  }
  func.func @transform_0(%arg0: i32, %arg1: i32) -> (i32, i32, i32) {
    %c0_i32 = arith.constant 0 : i32
    %c0_i32_0 = arith.constant 0 : i32
    return %arg1, %arg0, %c0_i32 : i32, i32, i32
  }
  func.func @transform_1(%arg0: i32, %arg1: i32) -> (i32, i32) {
    %c0_i32 = arith.constant 0 : i32
    %c0_i32_0 = arith.constant 0 : i32
    %c0_i32_1 = arith.constant 0 : i32
    return %c0_i32, %c0_i32_0 : i32, i32
  }
  func.func @transform_2(%arg0: i32, %arg1: i32) -> (i32, i32) {
    %c0_i32 = arith.constant 0 : i32
    %c0_i32_0 = arith.constant 0 : i32
    %c0_i32_1 = arith.constant 0 : i32
    return %c0_i32, %c0_i32_0 : i32, i32
  }
  func.func @transform_3(%arg0: i32, %arg1: i32) -> (i32, i32) {
    %c0_i32 = arith.constant 0 : i32
    %c0_i32_0 = arith.constant 0 : i32
    return %arg0, %c0_i32 : i32, i32
  }
  func.func @transform_4(%arg0: i32, %arg1: i32) -> (i32, i32, i32) {
    %c0_i32 = arith.constant 0 : i32
    %c0_i32_0 = arith.constant 0 : i32
    return %arg1, %arg0, %c0_i32 : i32, i32, i32
  }
}

</mosaic_0001>

<bundles_post_ra>
// kernel: tpu_custom_call.1
= control target key start
LH: loop header
LB: loop body
LE: loop exit
PB: predicated region body
PF: predicated region fallthrough
CT: control target
= control target key end

     0   :  { %9 = vsyncpa [#allocation3], 0  ;;  %s948_s0 = inlined_call_operand.vmem [shape: bf16[2,64,16], index: 0, kind: input, shape index: {}]   ;;  %s949_s1 = inlined_call_operand.vmem [shape: bf16[16,128], index: 1, kind: input, shape index: {}]   ;;  %s950_s2 = inlined_call_operand.vmem [shape: bf16[1,128], index: 2, kind: input, shape index: {}]   ;;  %s951_s3 = inlined_call_operand.vmem [shape: bf16[64,128], index: 3, kind: input, shape index: {}]   ;;  %s952_s4 = inlined_call_operand.hbm [shape: bf16[2,64,128], index: 4, kind: output, shape index: {}]  }
   0x1   :  { %11 = vsyncpa [#allocation3 + $0x1], 0  ;;  %s812_s15 = smov 0   ;;  %s814_s16 = smov 0  }
   0x2   :  { %s816_s17 = smov 0   ;;  %s818_s18 = smov 0  }
   0x3   :  { %s820_s19 = smov 0   ;;  %s822_s20 = smov 0  }
   0x4 LB: > { %s544_s21 = sadd.s32 4294967295, %s782_s20   ;;  %s545_s22 = sadd.s32 4294967294, %s782_s20   ;;  %s782_s20 = sphi %s822_s20, %s17_s20   ;;  %s778_s19 = sphi %s820_s19, %s959_s19   ;;  %s774_s18 = sphi %s818_s18, %s958_s18   ;;  %s770_s17 = sphi %s816_s17, %s957_s17   ;;  %s766_s16 = sphi %s814_s16, %s956_s16   ;;  %s762_s15 = sphi %s812_s15, %s955_s15  }
   0x5   : > { %s26_s23 = sadd.s32 1, %s778_s19  ;;  %s134_s24 = sadd.s32 1, %s770_s17 }
   0x6   : > { %p27_p0 = scmp.ge.s32.totalorder %s26_s23, 2  ;;  %p144_p1 = scmp.ne.s32.totalorder %s770_s17, %s766_s16 }
   0x7   : > { %p145_p2 = scmp.eq.s32.totalorder %s544_s21, 1  ;;  %p150_p3 = scmp.ne.s32.totalorder %s766_s16, %s762_s15 }
   0x8   : > { %s961_s23 = smov (%p27_p0, %s26_s23), 0  ;;  %p151_p5 = scmp.eq.s32.totalorder %s545_s22, 1 }
   0x9   : > { %p852_p4 = por %p145_p2, %p144_p1  ;;  %s129_s26 = ssub.s32 %s778_s19, %s961_s23 }
   0xa   : > { %p549_p6 = scmp.ge.s32.totalorder %s782_s20, 1  ;;  %p132_p7 = scmp.eq.s32.totalorder %s129_s26, 0 }
   0xb   : > { %p859_p8 = por %p151_p5, %p150_p3  ;;  %p197_p9 = scmp.lt.s32.totalorder %s782_s20, 3 }
   0xc   : > { %s865_s28 = scalar_select %p132_p7, %s770_s17, %s134_s24  }
   0xd   : > { %p198_p10 = pnand %p549_p6, %p197_p9 }
   0xe   : > { %p233_p11 = scmp.lt.s32.totalorder (!%p198_p10), %s774_s18, 1  ;;  %s229_s12 = sand.u32 (!%p198_p10), 1, %s766_s16  }
   0xf   : > { %201 = sbr.rel (%p198_p10) target bundleno = 245 (0xf5), region = 36  ;;  %s550_s29 = sshll.u32 (!%p198_p10), %s229_s12, 5 }
  0x10   : > { %s584_s8 = sshll.u32 (!%p198_p10), %s774_s18, 9  ;;  %s784_s14 = smov (!%p198_p10), [#allocation2]  }
  0x11   : > { %s899_s11 = scalar_lea.hbm (!%p198_p10), %s952_s4, %s584_s8  ;;  %s710_s21 = sshll.u32 (!%p198_p10), %s784_s14, 4  ;;  %s711_s21 = int_to_ptr.vmem [resolvable:$false] %s710_s21 }
  0x12   : > { %s712_s22 = scalar_lea.vmem (!%p198_p10), %s711_s21, 1024 }
  0x14   : > { %v701_v0 = vld [vmem:[%s949_s1] sm:$0xff]   ;;  %s234_s5 = scalar_select %p233_p11, %s774_s18, 1  ;;  %vm292_vm0 = vcmask 130048   ;;  %v262_v5 = vlaneseq  ;;  %v621_v12 = vld [vmem:[%s951_s3 + $0x8] sm:$0xff]   ;;  %v623_v14 = vld [vmem:[%s951_s3 + $0x18] sm:$0xff]  }
  0x15   : > { %632 = vmatprep.subr.bf16.mxu0 %v701_v0  ;;  %642 = vmatprep.subr.bf16.mxu1 %v701_v0  ;;  %v260_v7 = vld [vmem:[%s950_s2] sm:$0x1]  ;;  %v591_v18 = vunpack.c.l.bf16 %v621_v12  ;;  %v622_v20 = vld [vmem:[%s951_s3 + $0x10] sm:$0xff]   ;;  %v592_v21 = vunpack.c.h.bf16 %v621_v12  ;;  %v599_v23 = vunpack.c.l.bf16 %v623_v14  ;;  %v600_v25 = vunpack.c.h.bf16 %v623_v14  ;;  %s903_s18 = scalar_lea.sflag [#allocation3], %s229_s12 }
  0x16   : > { %633 = vmatpush3.bf16.msra.mxu0 %v701_v0  ;;  %643 = vmatpush3.bf16.msra.mxu1 %v701_v0  ;;  %s575_s6 = sshll.u32 %s234_s5, 5  ;;  %v263_v6 = vshrl.u32 %v262_v5, 7  ;;  %v261_v8 = vunpack.c.l.bf16 %v260_v7  ;;  %v586_v16 = vld [vmem:[%s951_s3] sm:$0xff]   ;;  %v595_v32 = vunpack.c.l.bf16 %v622_v20  ;;  %v596_v35 = vunpack.c.h.bf16 %v622_v20 }
  0x17   : > { %s240_s9 = scalar_lea.vmem %s948_s0, %s575_s6  ;;  %v587_v27 = vunpack.c.l.bf16 %v586_v16  ;;  %v588_v30 = vunpack.c.h.bf16 %v586_v16  ;;  %s231_s6 = scalar_lea.vmem [#allocation2], %s550_s29 }
  0x18   : > { %v702_v1 = vld [vmem:[%s240_s9] sm:$0xff]   ;;  %v703_v2 = vld [vmem:[%s240_s9 + $0x10] sm:$0xff]   ;;  %v704_v3 = vld [vmem:[%s240_s9 + $0x8] sm:$0xff]   ;;  %v264_v9 = vsub.s32 0, %v263_v6  ;;  %s450_s7 = sshll.u32 %s231_s6, 4  ;;  %s894_s7 = int_to_ptr.vmem [resolvable:$true] %s450_s7 }
  0x19   : > { %634 = vmatprep.mubr.msk.bf16.mxu0 %vm292_vm0, %v702_v1  ;;  %638 = vmatprep.mubr.msk.bf16.mxu1 %vm292_vm0, %v703_v2  ;;  %v705_v4 = vld [vmem:[%s240_s9 + $0x18] sm:$0xff]   ;;  %s706_s13 = scalar_lea.vmem %s894_s7, 512  ;;  %p713_p1 = scmp.lt.s32.totalorder %s894_s7, %s711_s21 }
  0x1a   : > { %635 = vmatmul.mubr.msk.bf16.vlgmr.msra.gmra.mxu0 %vm292_vm0, %v704_v3  ;;  %639 = vmatmul.mubr.msk.bf16.vlgmr.msra.gmra.mxu1 %vm292_vm0, %v705_v4  ;;  %v265_v10 = vrot.slane %v261_v8, %v264_v9  ;;  %p707_p12 = scmp.ne.s32.totalorder %s894_s7, %s706_s13  ;;  %p714_p2 = scmp.lt.s32.totalorder %s712_s22, %s706_s13 }
  0x1c   : > { %p708_p13 = pnand %p707_p12, %p852_p4  ;;  %p715_p3 = por %p714_p2, %p713_p1 }
  0x1e   : > { %p709_p0 = pneg %p708_p13 }
  0x20   : > { %p716_p5 = pnand %p715_p3, %p709_p0 }
  0xda   : > { %v636_v11 = vpop.f32.mrf.mxu0  ;;  %v640_v13 = vpop.f32.mrf.mxu1 }
  0xdb   : > { %v348_v17 = vadd.f32 %v636_v11, %v265_v10  ;;  %v364_v22 = vadd.f32 %v640_v13, %v265_v10 }
  0xdc   : > { %v339_v15 = vpop.f32.mrf.mxu0  ;;  %v355_v19 = vpop.f32.mrf.mxu1 }
  0xdd   : > { %v340_v26 = vadd.f32 %v339_v15, %v265_v10  ;;  %v356_v31 = vadd.f32 %v355_v19, %v265_v10  ;;  %v388_v36 = vadd.f32 %v591_v18, %v348_v17  ;;  %v392_v40 = vadd.f32 %v599_v23, %v364_v22 }
  0xde   : > { %v637_v24 = vpop.f32.mrf.mxu0  ;;  %v641_v29 = vpop.f32.mrf.mxu1 }
  0xdf   : > { %v351_v28 = vadd.f32 %v637_v24, %v265_v10  ;;  %v367_v33 = vadd.f32 %v641_v29, %v265_v10  ;;  %v386_v43 = vadd.f32 %v587_v27, %v340_v26  ;;  %v390_v46 = vadd.f32 %v595_v32, %v356_v31 }
  0xe0   : > { %v342_v34 = vpop.f32.mrf.mxu0  ;;  %v358_v39 = vpop.f32.mrf.mxu1 }
  0xe1   : > { %v389_v37 = vadd.f32 %v592_v21, %v351_v28  ;;  %v343_v38 = vadd.f32 %v342_v34, %v265_v10  ;;  %v393_v41 = vadd.f32 %v600_v25, %v367_v33  ;;  %v359_v42 = vadd.f32 %v358_v39, %v265_v10 }
  0xe3   : > { %v609_v44 = vpack.c.bf16 %v389_v37, %v388_v36  ;;  %v387_v45 = vadd.f32 %v588_v30, %v343_v38  ;;  %v619_v47 = vpack.c.bf16 %v393_v41, %v392_v40  ;;  %v391_v48 = vadd.f32 %v596_v35, %v359_v42 }
  0xe5   : > { %624 = vst [vmem:[%s231_s6 + $0x8] sm:$0xff] %v609_v44   ;;  %v604_v49 = vpack.c.bf16 %v387_v45, %v386_v43  ;;  %626 = vst [vmem:[%s231_s6 + $0x18] sm:$0xff] %v619_v47   ;;  %v614_v50 = vpack.c.bf16 %v391_v48, %v390_v46 }
  0xe7   : > { %605 = vst [vmem:[%s231_s6] sm:$0xff] %v604_v49   ;;  %625 = vst [vmem:[%s231_s6 + $0x10] sm:$0xff] %v614_v50  }
  0xe8   : > { %719 = shalt.err (!%p716_p5)
}
  0xe9   : > { %s720_s12 = scalar_lea.hbm %s899_s11, 512  ;;  %s724_s29 = scalar_lea.hbm %s952_s4, 1024 }
  0xea   : > { %p721_p6 = scmp.ne.s32.totalorder %s899_s11, %s720_s12  ;;  %p725_p10 = scmp.lt.s32.totalorder %s899_s11, %s952_s4 }
  0xeb   : > { %p726_p11 = scmp.lt.s32.totalorder %s724_s29, %s720_s12 }
  0xec   : > { %p722_p7 = pnand %p721_p6, %p852_p4 }
  0xed   : > { %p727_p12 = por %p726_p11, %p725_p10 }
  0xee   : > { %p723_p9 = pneg %p722_p7 }
  0xf0   : > { %p728_p13 = pnand %p727_p12, %p723_p9 }
  0xf2   : > { %731 = shalt.err (!%p728_p13)
}
  0xf3   : > { %s785_s6 = smov 64   ;;  %s786_s8 = smov 4  }
  0xf4   : > { %644 = dma.vmem_to_hbm [thread:$0]  (%p852_p4), %s894_s7, 512, %s899_s11, %s903_s18, %s785_s6, %s785_s6, %s786_s8  }
  0xf5 PF: > { %p650_p0 = scmp.ge.s32.totalorder %s782_s20, 2  ;;  %s465_s9 = sand.u32 1, %s762_s15  }
  0xf6   : > { %s466_s10 = scalar_lea.sflag [#allocation3], %s465_s9 }
  0xf7   : > { %p647_p1 = pnand %p650_p0, %p859_p8 }
  0xf9   : > { %p648_p2 = pneg %p647_p1 }
  0xfb   : > { %757 = dma.done.wait (%p648_p2), %s466_s10, 512  }
  0xfc   : > { %759 = vsyncadd (%p648_p2), %s466_s10, 4294966784  ;;  %s17_s20 = sadd.s32 1, %s782_s20   ;;  %s955_s15 = smov %s766_s16 }
  0xfd   : > { %p14_p3 = scmp.ge.s32.totalorder %s17_s20, 4   ;;  %s956_s16 = smov %s770_s17 }
  0xfe   : > { %s957_s17 = smov %s865_s28  ;;  %s958_s18 = smov %s778_s19 }
  0xff   : > { %s959_s19 = smov %s961_s23  ;;  %16 = sbr.rel (!%p14_p3) target bundleno = 4 (0x4), region = 74 }
 0x104   :  { %471 = vsyncpa [#allocation3], 1 }
 0x105   :  { %473 = vsyncpa [#allocation3 + $0x1], 1 }

</bundles_post_ra>
